<compile_context>
chip_gen: v7x
topology: tpu7x:2x2x1
jax: 0.10.0
libtpu: 0.0.40
codegen_flags: <defaults>
</compile_context>

<pallas_src>
import jax
import jax.numpy as jnp
from jax.experimental import pallas as pl
from jax.experimental.pallas import tpu as pltpu

FEATURE_1_ENCODE_DIM = 64
FEATURE_2_DIM = 4
FEATURE_3_ENCODE_DIM = 32
FEATURE_DIM = FEATURE_1_ENCODE_DIM + FEATURE_2_DIM + FEATURE_3_ENCODE_DIM  # 100
FEATURE_DIM_PADDED = 128   # pad K of first matmul to a lane-aligned 128

LAYER_DIMS = [FEATURE_DIM, 128, 64, 32, 2]
N_BN_LAYERS = 3            # first three layers carry BatchNorm1d
OUT_DIM = LAYER_DIMS[-1]   # 2
OUT_DIM_PADDED = 128       # pad N of last matmul; slice back to 2 at store

LEAKY_SLOPE = 0.2
BN_EPS = 1e-5

# Packed small-vector buffer: one 128-lane slot per vector param, in order
#   b1, g1, be1, b2, g2, be2, b3, g3, be3, b4
VEC_SLOT = 128
N_VEC_SLOTS = 3 * N_BN_LAYERS + 1   # = 10


def _leaky_relu(x):
    return jnp.maximum(x, LEAKY_SLOPE * x)


def _batchnorm_train(x, gamma, beta):
    # BatchNorm1d, training mode: batch mean / biased batch variance.
    mean = jnp.mean(x, axis=0, keepdims=True)
    xc = x - mean
    var = jnp.mean(xc * xc, axis=0, keepdims=True)
    return xc * jax.lax.rsqrt(var + BN_EPS) * gamma + beta


def dscrmntor_kernel(x_ref, w1_ref, w2_ref, w3_ref, w4_ref, vec_ref, o_ref):
    def vec(slot, dim):
        off = slot * VEC_SLOT
        return vec_ref[:, off:off + dim]

    # Layer 1: Linear(100->128) + LeakyReLU + BN
    h = jnp.dot(x_ref[...], w1_ref[...].astype(jnp.float32),
                preferred_element_type=jnp.float32) + vec(0, 128)
    h = _batchnorm_train(_leaky_relu(h), vec(1, 128), vec(2, 128))

    # Layer 2: Linear(128->64) + LeakyReLU + BN
    h = jnp.dot(h, w2_ref[...].astype(jnp.float32),
                preferred_element_type=jnp.float32) + vec(3, 64)
    h = _batchnorm_train(_leaky_relu(h), vec(4, 64), vec(5, 64))

    # Layer 3: Linear(64->32) + LeakyReLU + BN
    h = jnp.dot(h, w3_ref[...].astype(jnp.float32),
                preferred_element_type=jnp.float32) + vec(6, 32)
    h = _batchnorm_train(_leaky_relu(h), vec(7, 32), vec(8, 32))

    # Layer 4: Linear(32->2), no activation (logits). w4 is zero-padded to
    # N=128 for an aligned matmul; slice back to the real 2 output columns.
    h = jnp.dot(h, w4_ref[...].astype(jnp.float32),
                preferred_element_type=jnp.float32)
    o_ref[...] = h[:, 0:OUT_DIM] + vec(9, OUT_DIM)


def init_params(key):
    """PyTorch-like init. Linear weights pre-transposed to [in, out], bf16."""
    params = []
    keys = jax.random.split(key, 2 * (len(LAYER_DIMS) - 1))
    for li in range(len(LAYER_DIMS) - 1):
        d_in, d_out = LAYER_DIMS[li], LAYER_DIMS[li + 1]
        bound = 1.0 / jnp.sqrt(d_in)
        w = jax.random.uniform(keys[2 * li], (d_in, d_out), jnp.float32,
                               minval=-bound, maxval=bound)
        b = jax.random.uniform(keys[2 * li + 1], (d_out,), jnp.float32,
                               minval=-bound, maxval=bound)
        params.append(w.astype(jnp.bfloat16))   # weight DMA in bf16
        params.append(b)
        if li < N_BN_LAYERS:                    # BN: weight=1, bias=0
            params.append(jnp.ones((d_out,), jnp.float32))
            params.append(jnp.zeros((d_out,), jnp.float32))
    return params


def pack_params(params):
    """Host-side packing: pad w1/w4 for MXU alignment, pack vectors into one buffer."""
    p = list(params)
    ws = []
    vec = jnp.zeros((1, N_VEC_SLOTS * VEC_SLOT), jnp.float32)
    slot = 0
    idx = 0
    for li in range(len(LAYER_DIMS) - 1):
        d_out = LAYER_DIMS[li + 1]
        w, b = p[idx], p[idx + 1]
        idx += 2
        ws.append(w)
        vec = vec.at[0, slot * VEC_SLOT: slot * VEC_SLOT + d_out].set(b)
        slot += 1
        if li < N_BN_LAYERS:
            g, be = p[idx], p[idx + 1]
            idx += 2
            vec = vec.at[0, slot * VEC_SLOT: slot * VEC_SLOT + d_out].set(g)
            slot += 1
            vec = vec.at[0, slot * VEC_SLOT: slot * VEC_SLOT + d_out].set(be)
            slot += 1
    # Pad w1 rows (K: 100 -> 128) and w4 cols (N: 2 -> 128) with zeros.
    ws[0] = jnp.pad(ws[0], ((0, FEATURE_DIM_PADDED - FEATURE_DIM), (0, 0)))
    ws[3] = jnp.pad(ws[3], ((0, 0), (0, OUT_DIM_PADDED - OUT_DIM)))
    return tuple(ws) + (vec,)


def dscrmntor_forward(x, packed):
    w1, w2, w3, w4, vec = packed
    batch = x.shape[0]
    x_padded = jnp.pad(x, ((0, 0), (0, FEATURE_DIM_PADDED - FEATURE_DIM)))
    vmem = pl.BlockSpec(memory_space=pltpu.MemorySpace.VMEM)
    return pl.pallas_call(
        dscrmntor_kernel,
        out_shape=jax.ShapeDtypeStruct((batch, OUT_DIM), jnp.float32),
        in_specs=[vmem] * 6,
        out_specs=vmem,
        compiler_params=pltpu.CompilerParams(vmem_limit_bytes=16 << 20),
    )(x_padded, w1, w2, w3, w4, vec)


def dscrmntor_reference(x, params):
    """Pure-JAX reference using the same (bf16-quantized) weights."""
    p = list(params)
    h = x
    idx = 0
    for li in range(len(LAYER_DIMS) - 1):
        w, b = p[idx].astype(jnp.float32), p[idx + 1]
        idx += 2
        h = h @ w + b
        if li < N_BN_LAYERS:
            g, be = p[idx], p[idx + 1]
            idx += 2
            h = _batchnorm_train(_leaky_relu(h), g, be)
    return h


if __name__ == "__main__":
    key = jax.random.PRNGKey(0)
    k_x, k_p = jax.random.split(key)

    batch = 8  # BatchNorm1d training mode needs batch > 1
    x = jax.random.normal(k_x, (batch, FEATURE_DIM), jnp.float32)
    params = init_params(k_p)
    packed = pack_params(params)

    out = dscrmntor_forward(x, packed)
    out = jax.block_until_ready(out)

    ref = dscrmntor_reference(x, params)
    assert out.shape == (batch, OUT_DIM), out.shape
    assert jnp.allclose(out, ref, atol=5e-3, rtol=5e-3), \
        f"max abs err {jnp.max(jnp.abs(out - ref))}"

    print("KERNEL_OK")
</pallas_src>

<mosaic_0001>
module attributes {stable_mosaic.version = 11 : i64} {
  func.func @dscrmntor_kernel(%arg0: memref<8x128xf32, #tpu.memory_space<vmem>>, %arg1: memref<128x128xbf16, #tpu.memory_space<vmem>>, %arg2: memref<128x64xbf16, #tpu.memory_space<vmem>>, %arg3: memref<64x32xbf16, #tpu.memory_space<vmem>>, %arg4: memref<32x128xbf16, #tpu.memory_space<vmem>>, %arg5: memref<1x1280xf32, #tpu.memory_space<vmem>>, %arg6: memref<8x2xf32, #tpu.memory_space<vmem>>) attributes {dimension_semantics = [], scalar_prefetch = 0 : i64, scratch_operands = 0 : i64, tpu.core_type = #tpu.core_type<tc>} {
    %c0 = arith.constant 0 : index
    %c0_0 = arith.constant 0 : index
    %0 = vector.load %arg0[%c0, %c0_0] : memref<8x128xf32, #tpu.memory_space<vmem>>, vector<8x128xf32>
    %c0_1 = arith.constant 0 : index
    %c0_2 = arith.constant 0 : index
    %1 = vector.load %arg1[%c0_1, %c0_2] : memref<128x128xbf16, #tpu.memory_space<vmem>>, vector<128x128xbf16>
    %2 = arith.extf %1 : vector<128x128xbf16> to vector<128x128xf32>
    %cst = arith.constant dense<0.000000e+00> : vector<8x128xf32>
    %3 = tpu.matmul %0, %2, %cst {dimension_numbers = #tpu.dot_dimension_numbers<[1], [0], [0], [1], [0, 0, 1, 1], [], []>} : vector<8x128xf32>, vector<128x128xf32>, vector<8x128xf32> -> vector<8x128xf32>
    %c0_3 = arith.constant 0 : index
    %c0_4 = arith.constant 0 : index
    %4 = vector.load %arg5[%c0_3, %c0_4] : memref<1x1280xf32, #tpu.memory_space<vmem>>, vector<1x128xf32>
    %5 = vector.broadcast %4 : vector<1x128xf32> to vector<8x128xf32>
    %6 = arith.addf %3, %5 : vector<8x128xf32>
    %cst_5 = arith.constant 2.000000e-01 : f32
    %7 = vector.broadcast %cst_5 : f32 to vector<8x128xf32>
    %8 = arith.mulf %7, %6 : vector<8x128xf32>
    %9 = arith.maximumf %6, %8 : vector<8x128xf32>
    %c0_6 = arith.constant 0 : index
    %c128 = arith.constant 128 : index
    %10 = vector.load %arg5[%c0_6, %c128] : memref<1x1280xf32, #tpu.memory_space<vmem>>, vector<1x128xf32>
    %c0_7 = arith.constant 0 : index
    %c256 = arith.constant 256 : index
    %11 = vector.load %arg5[%c0_7, %c256] : memref<1x1280xf32, #tpu.memory_space<vmem>>, vector<1x128xf32>
    %cst_8 = arith.constant dense<0.000000e+00> : vector<128xf32>
    %12 = vector.multi_reduction <add>, %9, %cst_8 [0] : vector<8x128xf32> to vector<128xf32>
    %13 = vector.shape_cast %12 : vector<128xf32> to vector<1x128xf32>
    %cst_9 = arith.constant 8.000000e+00 : f32
    %14 = vector.broadcast %cst_9 : f32 to vector<1x128xf32>
    %15 = arith.divf %13, %14 : vector<1x128xf32>
    %16 = vector.broadcast %15 : vector<1x128xf32> to vector<8x128xf32>
    %17 = arith.subf %9, %16 : vector<8x128xf32>
    %18 = arith.mulf %17, %17 : vector<8x128xf32>
    %cst_10 = arith.constant dense<0.000000e+00> : vector<128xf32>
    %19 = vector.multi_reduction <add>, %18, %cst_10 [0] : vector<8x128xf32> to vector<128xf32>
    %20 = vector.shape_cast %19 : vector<128xf32> to vector<1x128xf32>
    %cst_11 = arith.constant 8.000000e+00 : f32
    %21 = vector.broadcast %cst_11 : f32 to vector<1x128xf32>
    %22 = arith.divf %20, %21 : vector<1x128xf32>
    %cst_12 = arith.constant 9.99999974E-6 : f32
    %23 = vector.broadcast %cst_12 : f32 to vector<1x128xf32>
    %24 = arith.addf %22, %23 : vector<1x128xf32>
    %25 = math.rsqrt %24 : vector<1x128xf32>
    %26 = vector.broadcast %25 : vector<1x128xf32> to vector<8x128xf32>
    %27 = arith.mulf %17, %26 : vector<8x128xf32>
    %28 = vector.broadcast %10 : vector<1x128xf32> to vector<8x128xf32>
    %29 = arith.mulf %27, %28 : vector<8x128xf32>
    %30 = vector.broadcast %11 : vector<1x128xf32> to vector<8x128xf32>
    %31 = arith.addf %29, %30 : vector<8x128xf32>
    %c0_13 = arith.constant 0 : index
    %c0_14 = arith.constant 0 : index
    %32 = vector.load %arg2[%c0_13, %c0_14] : memref<128x64xbf16, #tpu.memory_space<vmem>>, vector<128x64xbf16>
    %33 = arith.extf %32 : vector<128x64xbf16> to vector<128x64xf32>
    %cst_15 = arith.constant dense<0.000000e+00> : vector<8x64xf32>
    %34 = tpu.matmul %31, %33, %cst_15 {dimension_numbers = #tpu.dot_dimension_numbers<[1], [0], [0], [1], [0, 0, 1, 1], [], []>} : vector<8x128xf32>, vector<128x64xf32>, vector<8x64xf32> -> vector<8x64xf32>
    %c0_16 = arith.constant 0 : index
    %c384 = arith.constant 384 : index
    %35 = vector.load %arg5[%c0_16, %c384] : memref<1x1280xf32, #tpu.memory_space<vmem>>, vector<1x64xf32>
    %36 = vector.broadcast %35 : vector<1x64xf32> to vector<8x64xf32>
    %37 = arith.addf %34, %36 : vector<8x64xf32>
    %cst_17 = arith.constant 2.000000e-01 : f32
    %38 = vector.broadcast %cst_17 : f32 to vector<8x64xf32>
    %39 = arith.mulf %38, %37 : vector<8x64xf32>
    %40 = arith.maximumf %37, %39 : vector<8x64xf32>
    %c0_18 = arith.constant 0 : index
    %c512 = arith.constant 512 : index
    %41 = vector.load %arg5[%c0_18, %c512] : memref<1x1280xf32, #tpu.memory_space<vmem>>, vector<1x64xf32>
    %c0_19 = arith.constant 0 : index
    %c640 = arith.constant 640 : index
    %42 = vector.load %arg5[%c0_19, %c640] : memref<1x1280xf32, #tpu.memory_space<vmem>>, vector<1x64xf32>
    %cst_20 = arith.constant dense<0.000000e+00> : vector<64xf32>
    %43 = vector.multi_reduction <add>, %40, %cst_20 [0] : vector<8x64xf32> to vector<64xf32>
    %44 = vector.shape_cast %43 : vector<64xf32> to vector<1x64xf32>
    %cst_21 = arith.constant 8.000000e+00 : f32
    %45 = vector.broadcast %cst_21 : f32 to vector<1x64xf32>
    %46 = arith.divf %44, %45 : vector<1x64xf32>
    %47 = vector.broadcast %46 : vector<1x64xf32> to vector<8x64xf32>
    %48 = arith.subf %40, %47 : vector<8x64xf32>
    %49 = arith.mulf %48, %48 : vector<8x64xf32>
    %cst_22 = arith.constant dense<0.000000e+00> : vector<64xf32>
    %50 = vector.multi_reduction <add>, %49, %cst_22 [0] : vector<8x64xf32> to vector<64xf32>
    %51 = vector.shape_cast %50 : vector<64xf32> to vector<1x64xf32>
    %cst_23 = arith.constant 8.000000e+00 : f32
    %52 = vector.broadcast %cst_23 : f32 to vector<1x64xf32>
    %53 = arith.divf %51, %52 : vector<1x64xf32>
    %cst_24 = arith.constant 9.99999974E-6 : f32
    %54 = vector.broadcast %cst_24 : f32 to vector<1x64xf32>
    %55 = arith.addf %53, %54 : vector<1x64xf32>
    %56 = math.rsqrt %55 : vector<1x64xf32>
    %57 = vector.broadcast %56 : vector<1x64xf32> to vector<8x64xf32>
    %58 = arith.mulf %48, %57 : vector<8x64xf32>
    %59 = vector.broadcast %41 : vector<1x64xf32> to vector<8x64xf32>
    %60 = arith.mulf %58, %59 : vector<8x64xf32>
    %61 = vector.broadcast %42 : vector<1x64xf32> to vector<8x64xf32>
    %62 = arith.addf %60, %61 : vector<8x64xf32>
    %c0_25 = arith.constant 0 : index
    %c0_26 = arith.constant 0 : index
    %63 = vector.load %arg3[%c0_25, %c0_26] : memref<64x32xbf16, #tpu.memory_space<vmem>>, vector<64x32xbf16>
    %64 = arith.extf %63 : vector<64x32xbf16> to vector<64x32xf32>
    %cst_27 = arith.constant dense<0.000000e+00> : vector<8x32xf32>
    %65 = tpu.matmul %62, %64, %cst_27 {dimension_numbers = #tpu.dot_dimension_numbers<[1], [0], [0], [1], [0, 0, 1, 1], [], []>} : vector<8x64xf32>, vector<64x32xf32>, vector<8x32xf32> -> vector<8x32xf32>
    %c0_28 = arith.constant 0 : index
    %c768 = arith.constant 768 : index
    %66 = vector.load %arg5[%c0_28, %c768] : memref<1x1280xf32, #tpu.memory_space<vmem>>, vector<1x32xf32>
    %67 = vector.broadcast %66 : vector<1x32xf32> to vector<8x32xf32>
    %68 = arith.addf %65, %67 : vector<8x32xf32>
    %cst_29 = arith.constant 2.000000e-01 : f32
    %69 = vector.broadcast %cst_29 : f32 to vector<8x32xf32>
    %70 = arith.mulf %69, %68 : vector<8x32xf32>
    %71 = arith.maximumf %68, %70 : vector<8x32xf32>
    %c0_30 = arith.constant 0 : index
    %c896 = arith.constant 896 : index
    %72 = vector.load %arg5[%c0_30, %c896] : memref<1x1280xf32, #tpu.memory_space<vmem>>, vector<1x32xf32>
    %c0_31 = arith.constant 0 : index
    %c1024 = arith.constant 1024 : index
    %73 = vector.load %arg5[%c0_31, %c1024] : memref<1x1280xf32, #tpu.memory_space<vmem>>, vector<1x32xf32>
    %cst_32 = arith.constant dense<0.000000e+00> : vector<32xf32>
    %74 = vector.multi_reduction <add>, %71, %cst_32 [0] : vector<8x32xf32> to vector<32xf32>
    %75 = vector.shape_cast %74 : vector<32xf32> to vector<1x32xf32>
    %cst_33 = arith.constant 8.000000e+00 : f32
    %76 = vector.broadcast %cst_33 : f32 to vector<1x32xf32>
    %77 = arith.divf %75, %76 : vector<1x32xf32>
    %78 = vector.broadcast %77 : vector<1x32xf32> to vector<8x32xf32>
    %79 = arith.subf %71, %78 : vector<8x32xf32>
    %80 = arith.mulf %79, %79 : vector<8x32xf32>
    %cst_34 = arith.constant dense<0.000000e+00> : vector<32xf32>
    %81 = vector.multi_reduction <add>, %80, %cst_34 [0] : vector<8x32xf32> to vector<32xf32>
    %82 = vector.shape_cast %81 : vector<32xf32> to vector<1x32xf32>
    %cst_35 = arith.constant 8.000000e+00 : f32
    %83 = vector.broadcast %cst_35 : f32 to vector<1x32xf32>
    %84 = arith.divf %82, %83 : vector<1x32xf32>
    %cst_36 = arith.constant 9.99999974E-6 : f32
    %85 = vector.broadcast %cst_36 : f32 to vector<1x32xf32>
    %86 = arith.addf %84, %85 : vector<1x32xf32>
    %87 = math.rsqrt %86 : vector<1x32xf32>
    %88 = vector.broadcast %87 : vector<1x32xf32> to vector<8x32xf32>
    %89 = arith.mulf %79, %88 : vector<8x32xf32>
    %90 = vector.broadcast %72 : vector<1x32xf32> to vector<8x32xf32>
    %91 = arith.mulf %89, %90 : vector<8x32xf32>
    %92 = vector.broadcast %73 : vector<1x32xf32> to vector<8x32xf32>
    %93 = arith.addf %91, %92 : vector<8x32xf32>
    %c0_37 = arith.constant 0 : index
    %c0_38 = arith.constant 0 : index
    %94 = vector.load %arg4[%c0_37, %c0_38] : memref<32x128xbf16, #tpu.memory_space<vmem>>, vector<32x128xbf16>
    %95 = arith.extf %94 : vector<32x128xbf16> to vector<32x128xf32>
    %cst_39 = arith.constant dense<0.000000e+00> : vector<8x128xf32>
    %96 = tpu.matmul %93, %95, %cst_39 {dimension_numbers = #tpu.dot_dimension_numbers<[1], [0], [0], [1], [0, 0, 1, 1], [], []>} : vector<8x32xf32>, vector<32x128xf32>, vector<8x128xf32> -> vector<8x128xf32>
    %97 = vector.extract_strided_slice %96 {offsets = [0, 0], sizes = [8, 2], strides = [1, 1]} : vector<8x128xf32> to vector<8x2xf32>
    %c0_40 = arith.constant 0 : index
    %c1152 = arith.constant 1152 : index
    %98 = vector.load %arg5[%c0_40, %c1152] : memref<1x1280xf32, #tpu.memory_space<vmem>>, vector<1x2xf32>
    %99 = vector.broadcast %98 : vector<1x2xf32> to vector<8x2xf32>
    %100 = arith.addf %97, %99 : vector<8x2xf32>
    %c0_41 = arith.constant 0 : index
    %c0_42 = arith.constant 0 : index
    %101 = vector.load %arg6[%c0_41, %c0_42] : memref<8x2xf32, #tpu.memory_space<vmem>>, vector<8x2xf32>
    tpu.vector_store %arg6[%c0_41, %c0_42], %100 {strides = array<i32>} : memref<8x2xf32, #tpu.memory_space<vmem>>, vector<8x2xf32>,
    return
  }
}

</mosaic_0001>

<bundles_post_ra>
// kernel: tpu_custom_call.1
= control target key start
LH: loop header
LB: loop body
LE: loop exit
PB: predicated region body
PF: predicated region fallthrough
CT: control target
= control target key end

     0   :  { %v892_v0 = vmov 0.0|0.0   ;;  %vm893_vm0 = vmmov 0   ;;  %v894_v2 = vmov 0.0   ;;  %vm284_vm1 = vcmask 523264   ;;  %s1068_s1 = inlined_call_operand.vmem [shape: bf16[128,128], index: 1, kind: input, shape index: {}]   ;;  %s1069_s0 = inlined_call_operand.vmem [shape: f32[8,128], index: 0, kind: input, shape index: {}]   ;;  %s1070_s2 = inlined_call_operand.vmem [shape: bf16[128,64], index: 2, kind: input, shape index: {}]   ;;  %s1071_s5 = inlined_call_operand.vmem [shape: f32[1,1280], index: 5, kind: input, shape index: {}]   ;;  %s1072_s3 = inlined_call_operand.vmem [shape: bf16[64,32], index: 3, kind: input, shape index: {}]   ;;  %s1073_s4 = inlined_call_operand.vmem [shape: bf16[32,128], index: 4, kind: input, shape index: {}]   ;;  %s1074_s6 = inlined_call_operand.vmem [shape: f32[8,2], index: 6, kind: output, shape index: {}]  }
   0x1   :  { %817 = vmatprep.subr.bf16.mxu0 %v892_v0  ;;  %v564_v1 = vld [vmem:[%s1068_s1] sm:$0xff]   ;;  %749 = vmatprep.mubr.msk.f32.mxu0 %vm893_vm0, %v894_v2  ;;  %v651_v3 = vld [vmem:[%s1068_s1 + $0x8] sm:$0xff]   ;;  %v652_v4 = vld [vmem:[%s1068_s1 + $0x10] sm:$0xff]   ;;  %vm420_vm2 = vcmask 261120   ;;  %vm545_vm3 = vcmask 15360  }
   0x2   :  { %819 = vmatpush3.bf16.msra.mxu0 %v564_v1  ;;  %841 = vmatprep.subr.bf16.mxu1 %v892_v0  ;;  %v653_v5 = vld [vmem:[%s1068_s1 + $0x18] sm:$0xff]   ;;  %v654_v6 = vld [vmem:[%s1068_s1 + $0x20] sm:$0xff]   ;;  %v655_v7 = vld [vmem:[%s1068_s1 + $0x28] sm:$0xff]  }
   0x3   :  { %820 = vmatprep.subr.bf16.mxu0 %v892_v0  ;;  %784 = vmatprep.mubr.msk.f32.mxu1 %vm893_vm0, %v894_v2  ;;  %v656_v8 = vld [vmem:[%s1068_s1 + $0x30] sm:$0xff]   ;;  %v657_v9 = vld [vmem:[%s1068_s1 + $0x38] sm:$0xff]   ;;  %v23_v10 = vld [vmem:[%s1069_s0] sm:$0xff] }
   0x4   :  { %v596_v11 = vld [vmem:[%s1070_s2] sm:$0xff]   ;;  %v658_v12 = vld [vmem:[%s1070_s2 + $0x8] sm:$0xff]   ;;  %v659_v13 = vld [vmem:[%s1070_s2 + $0x10] sm:$0xff]  }
   0x5   :  { %843 = vmatpush3.bf16.msra.mxu1 %v596_v11  ;;  %v660_v14 = vld [vmem:[%s1070_s2 + $0x18] sm:$0xff]   ;;  %v661_v15 = vld [vmem:[%s1070_s2 + $0x20] sm:$0xff]   ;;  %v662_v16 = vld [vmem:[%s1070_s2 + $0x28] sm:$0xff]  }
   0x6   :  { %822 = vmatpush3.bf16.msra.mxu0 %v651_v3  ;;  %844 = vmatprep.subr.bf16.mxu1 %v892_v0  ;;  %v663_v17 = vld [vmem:[%s1070_s2 + $0x30] sm:$0xff]   ;;  %v664_v18 = vld [vmem:[%s1070_s2 + $0x38] sm:$0xff]   ;;  %v551_v19 = vld [vmem:[%s1071_s5] ss:$0 sm:$0xff] }
   0x7   :  { %823 = vmatprep.subr.bf16.mxu0 %v892_v0  ;;  %v552_v43 = vld [vmem:[%s1071_s5 + $0x1] ss:$0 sm:$0xff]  ;;  %v553_v45 = vld [vmem:[%s1071_s5 + $0x2] ss:$0 sm:$0xff]  ;;  %v665_v49 = vld [vmem:[%s1072_s3 + $0x8] sm:$0xff]  }
   0x8   :  { %v628_v48 = vld [vmem:[%s1072_s3] sm:$0xff]   ;;  %v666_v50 = vld [vmem:[%s1072_s3 + $0x10] sm:$0xff]   ;;  %v667_v51 = vld [vmem:[%s1072_s3 + $0x18] sm:$0xff]  }
   0x9   :  { %846 = vmatpush3.bf16.msra.mxu1 %v658_v12  ;;  %v554_v52 = vld [vmem:[%s1071_s5 + $0x3] ss:$0 sm:$0xff] }
   0xa   :  { %825 = vmatpush3.bf16.msra.mxu0 %v652_v4  ;;  %847 = vmatprep.subr.bf16.mxu1 %v892_v0 }
   0xb   :  { %826 = vmatprep.subr.bf16.mxu0 %v892_v0 }
   0xd   :  { %849 = vmatpush3.bf16.msra.mxu1 %v659_v13 }
   0xe   :  { %828 = vmatpush3.bf16.msra.mxu0 %v653_v5  ;;  %850 = vmatprep.subr.bf16.mxu1 %v892_v0 }
   0xf   :  { %829 = vmatprep.subr.bf16.mxu0 %v892_v0 }
  0x11   :  { %852 = vmatpush3.bf16.msra.mxu1 %v660_v14 }
  0x12   :  { %831 = vmatpush3.bf16.msra.mxu0 %v654_v6  ;;  %853 = vmatprep.subr.bf16.mxu1 %v892_v0 }
  0x13   :  { %832 = vmatprep.subr.bf16.mxu0 %v892_v0 }
  0x15   :  { %855 = vmatpush3.bf16.msra.mxu1 %v661_v15  ;;  %v555_v15 = vld [vmem:[%s1071_s5 + $0x4] ss:$0 sm:$0xff] }
  0x16   :  { %834 = vmatpush3.bf16.msra.mxu0 %v655_v7  ;;  %856 = vmatprep.subr.bf16.mxu1 %v892_v0 }
  0x17   :  { %835 = vmatprep.subr.bf16.mxu0 %v892_v0 }
  0x19   :  { %858 = vmatpush3.bf16.msra.mxu1 %v662_v16 }
  0x1a   :  { %837 = vmatpush3.bf16.msra.mxu0 %v656_v8  ;;  %859 = vmatprep.subr.bf16.mxu1 %v892_v0 }
  0x1b   :  { %838 = vmatprep.subr.bf16.mxu0 %v892_v0 }
  0x1d   :  { %861 = vmatpush3.bf16.msra.mxu1 %v663_v17  ;;  %v556_v17 = vld [vmem:[%s1071_s5 + $0x5] ss:$0 sm:$0xff] }
  0x1e   :  { %840 = vmatpush3.bf16.msra.mxu0 %v657_v9  ;;  %862 = vmatprep.subr.bf16.mxu1 %v892_v0 }
  0x1f   :  { %865 = vmatprep.subr.bf16.mxu0 %v892_v0 }
  0x21   :  { %750 = vmatmul.mubr.f32.vlgmr.msra.gmra.mrb[0].mxu0 %v23_v10  ;;  %864 = vmatpush3.bf16.msra.mxu1 %v664_v18 }
  0x22   :  { %803 = vmatprep.mubr.msk.f32.mxu0 %vm893_vm0, %v894_v2  ;;  %877 = vmatprep.subr.bf16.mxu1 %v892_v0 }
  0x23   :  { %867 = vmatpush3.bf16.msra.mxu0 %v628_v48 }
  0x24   :  { %868 = vmatprep.subr.bf16.mxu0 %v892_v0 }
  0x27   :  { %870 = vmatpush3.bf16.msra.mxu0 %v665_v49  ;;  %v560_v49 = vld [vmem:[%s1071_s5 + $0x8] ss:$0 sm:$0xff] }
  0x28   :  { %871 = vmatprep.subr.bf16.mxu0 %v892_v0 }
  0x2b   :  { %873 = vmatpush3.bf16.msra.mxu0 %v666_v50 }
  0x2c   :  { %874 = vmatprep.subr.bf16.mxu0 %v892_v0 }
  0x2f   :  { %876 = vmatpush3.bf16.msra.mxu0 %v667_v51 }
  0xf4   :  { %v129_v20 = vpop.f32.mrb[0].mxu0 }
  0xf5   :  { %v130_v21 = vadd.f32 %v551_v19, %v129_v20  ;;  %v751_v22 = vpop.f32.mrb[1].mxu0  ;;  %v644_v20 = vld [vmem:[%s1073_s4] sm:$0xff]  }
  0xf6   :  { %v557_v22 = vld [vmem:[%s1071_s5 + $0x6] ss:$0 sm:$0xff] }
  0xf7   :  { %v133_v23 = vmul.f32 0.2, %v130_v21 }
  0xf9   :  { %v134_v24 = vmax.f32 %v130_v21, %v133_v23  ;;  %v668_v21 = vld [vmem:[%s1073_s4 + $0x8] sm:$0xff]  }
  0xfb   :  { %v137_v25 = vrot.slane %v134_v24, 4 }
  0xfd   :  { %v138_v26 = vadd.f32 %v137_v25, %v134_v24 }
  0xff   :  { %v139_v27 = vrot.slane %v138_v26, 2 }
 0x101   :  { %v140_v28 = vadd.f32 %v139_v27, %v138_v26 }
 0x103   :  { %v141_v29 = vrot.slane %v140_v28, 1 }
 0x105   :  { %v142_v30 = vadd.f32 %v141_v29, %v140_v28 }
 0x107   :  { %v144_v31 = vmul.f32 0.125, %v142_v30 }
 0x109   :  { %v145_v32 = vsub.f32 %v134_v24, %v144_v31 }
 0x10b   :  { %v146_v33 = vmul.f32 %v145_v32, %v145_v32 }
 0x10d   :  { %v147_v34 = vrot.slane %v146_v33, 4 }
 0x10f   :  { %v148_v35 = vadd.f32 %v147_v34, %v146_v33 }
 0x111   :  { %v149_v36 = vrot.slane %v148_v35, 2 }
 0x113   :  { %v150_v37 = vadd.f32 %v149_v36, %v148_v35 }
 0x115   :  { %v151_v38 = vrot.slane %v150_v37, 1 }
 0x117   :  { %v152_v39 = vadd.f32 %v151_v38, %v150_v37 }
 0x119   :  { %v153_v40 = vmul.f32 0.125, %v152_v39 }
 0x11b   :  { %v154_v41 = vadd.f32 1e-05, %v153_v40 }
 0x11d   :  { %886 = vrsqrt.f32 %v154_v41 }
 0x127   :  { %v887_v42 = vpop.eup %886 }
 0x128   :  { %v156_v44 = vmul.f32 %v887_v42, %v145_v32 }
 0x12a   :  { %v163_v46 = vmul.f32 %v552_v43, %v156_v44 }
 0x12c   :  { %v170_v47 = vadd.f32 %v553_v45, %v163_v46 }
 0x12e   :  { %785 = vmatmul.mubr.f32.vlgmr.msra.gmra.mrb[0].mxu1 %v170_v47  ;;  %v559_v47 = vld [vmem:[%s1071_s5 + $0x7] ss:$0 sm:$0xff] }
 0x12f   :  { %814 = vmatprep.mubr.msk.f32.mxu1 %vm893_vm0, %v894_v2  ;;  %879 = vmatpush3.bf16.msra.mxu1 %v644_v20 }
 0x130   :  { %880 = vmatprep.subr.bf16.mxu1 %v892_v0 }
 0x133   :  { %882 = vmatpush3.bf16.msra.mxu1 %v668_v21 }
 0x201   :  { %v276_v53 = vpop.f32.mrb[0].mxu1 }
 0x202   :  { %v277_v54 = vadd.f32 %v554_v52, %v276_v53  ;;  %v786_v55 = vpop.f32.mrb[1].mxu1  ;;  %v562_v52 = vld [vmem:[%s1071_s5 + $0x9] ss:$0 sm:$0xff] }
 0x204   :  { %v280_v56 = vmul.f32 0.2, %v277_v54 }
 0x206   :  { %v281_v57 = vmax.f32 %v277_v54, %v280_v56 }
 0x208   :  { %v285_v58 = vsel %vm284_vm1, %v281_v57, 0.0 }
 0x209   :  { %v286_v59 = vrot.slane %v285_v58, 4 }
 0x20b   :  { %v287_v60 = vadd.f32 %v286_v59, %v285_v58 }
 0x20d   :  { %v288_v61 = vrot.slane %v287_v60, 2 }
 0x20f   :  { %v289_v62 = vadd.f32 %v288_v61, %v287_v60 }
 0x211   :  { %v290_v63 = vrot.slane %v289_v62, 1 }
 0x213   :  { %v291_v1 = vadd.f32 %v290_v63, %v289_v62 }
 0x215   :  { %v292_v2 = vmul.f32 0.125, %v291_v1 }
 0x217   :  { %v293_v3 = vsub.f32 %v281_v57, %v292_v2 }
 0x219   :  { %v294_v4 = vmul.f32 %v293_v3, %v293_v3 }
 0x21b   :  { %v295_v5 = vsel %vm284_vm1, %v294_v4, 0.0 }
 0x21c   :  { %v296_v6 = vrot.slane %v295_v5, 4 }
 0x21e   :  { %v297_v7 = vadd.f32 %v296_v6, %v295_v5 }
 0x220   :  { %v298_v8 = vrot.slane %v297_v7, 2 }
 0x222   :  { %v299_v9 = vadd.f32 %v298_v8, %v297_v7 }
 0x224   :  { %v300_v10 = vrot.slane %v299_v9, 1 }
 0x226   :  { %v301_v11 = vadd.f32 %v300_v10, %v299_v9 }
 0x228   :  { %v302_v12 = vmul.f32 0.125, %v301_v11 }
 0x22a   :  { %v303_v13 = vadd.f32 1e-05, %v302_v12 }
 0x22c   :  { %888 = vrsqrt.f32 %v303_v13 }
 0x236   :  { %v889_v14 = vpop.eup %888 }
 0x237   :  { %v305_v16 = vmul.f32 %v889_v14, %v293_v3 }
 0x239   :  { %v312_v18 = vmul.f32 %v555_v15, %v305_v16 }
 0x23b   :  { %v319_v19 = vadd.f32 %v556_v17, %v312_v18 }
 0x23d   :  { %804 = vmatmul.mubr.msk.f32.vlgmr.msra.gmra.mrb[2].mxu0 %vm284_vm1, %v319_v19 }
 0x310   :  { %v412_v23 = vpop.f32.mrb[2].mxu0 }
 0x311   :  { %v413_v24 = vadd.f32 %v557_v22, %v412_v23  ;;  %v805_v25 = vpop.f32.mrb[3].mxu0 }
 0x313   :  { %v416_v26 = vmul.f32 0.2, %v413_v24 }
 0x315   :  { %v417_v27 = vmax.f32 %v413_v24, %v416_v26 }
 0x317   :  { %v421_v28 = vsel %vm420_vm2, %v417_v27, 0.0 }
 0x318   :  { %v422_v29 = vrot.slane %v421_v28, 4 }
 0x31a   :  { %v423_v30 = vadd.f32 %v422_v29, %v421_v28 }
 0x31c   :  { %v424_v0 = vrot.slane %v423_v30, 2 }
 0x31e   :  { %v425_v31 = vadd.f32 %v424_v0, %v423_v30 }
 0x320   :  { %v426_v32 = vrot.slane %v425_v31, 1 }
 0x322   :  { %v427_v33 = vadd.f32 %v426_v32, %v425_v31 }
 0x324   :  { %v428_v34 = vmul.f32 0.125, %v427_v33 }
 0x326   :  { %v429_v35 = vsub.f32 %v417_v27, %v428_v34 }
 0x328   :  { %v430_v36 = vmul.f32 %v429_v35, %v429_v35 }
 0x32a   :  { %v431_v37 = vsel %vm420_vm2, %v430_v36, 0.0 }
 0x32b   :  { %v432_v38 = vrot.slane %v431_v37, 4 }
 0x32d   :  { %v433_v39 = vadd.f32 %v432_v38, %v431_v37 }
 0x32f   :  { %v434_v40 = vrot.slane %v433_v39, 2 }
 0x331   :  { %v435_v41 = vadd.f32 %v434_v40, %v433_v39 }
 0x333   :  { %v436_v42 = vrot.slane %v435_v41, 1 }
 0x335   :  { %v437_v43 = vadd.f32 %v436_v42, %v435_v41 }
 0x337   :  { %v438_v44 = vmul.f32 0.125, %v437_v43 }
 0x339   :  { %v439_v45 = vadd.f32 1e-05, %v438_v44 }
 0x33b   :  { %890 = vrsqrt.f32 %v439_v45 }
 0x345   :  { %v891_v46 = vpop.eup %890 }
 0x346   :  { %v441_v48 = vmul.f32 %v891_v46, %v429_v35 }
 0x348   :  { %v448_v50 = vmul.f32 %v559_v47, %v441_v48 }
 0x34a   :  { %v455_v51 = vadd.f32 %v560_v49, %v448_v50 }
 0x34c   :  { %815 = vmatmul.mubr.msk.f32.vlgmr.msra.gmra.mrb[2].mxu1 %vm420_vm2, %v455_v51 }
 0x41f   :  { %v533_v53 = vpop.f32.mrb[2].mxu1 }
 0x420   :  { %v544_v54 = vadd.f32 %v562_v52, %v533_v53  ;;  %v816_v55 = vpop.f32.mrb[3].mxu1 }
 0x422   :  { %546 = vst.msk [vmem:[%s1074_s6] sm:$0xff] %vm545_vm3, %v544_v54 }

</bundles_post_ra>
